<compile_context>
chip_gen: v7x
topology: tpu7x:2x2x1
jax: 0.10.0
libtpu: 0.0.40
codegen_flags: <defaults>
</compile_context>

<pallas_src>
import functools

import jax
import jax.numpy as jnp
from jax import lax
from jax.experimental import pallas as pl
from jax.experimental.pallas import tpu as pltpu

LANES = 128
MAX_ROW_TILE = 4096          # 4096 x 128 f32 = 2 MiB per input per pipeline buffer
SMALL_N_FAST_PATH = 1 << 20  # below this, fused XLA beats kernel-launch overhead


def _sublane_multiple(dtype) -> int:
    # f32 -> 8, bf16/f16 -> 16, int8/fp8/bool -> 32 (packed sublane groups)
    return max(8, 32 // jnp.dtype(dtype).itemsize)


def _round_up(x, m):
    return ((x + m - 1) // m) * m


def _focal_loss_jnp(y_true, y_pred, gamma, alpha):
    """Plain-JAX reference; also used as the small-n fast path."""
    yt = y_true.astype(jnp.float32)
    yp = y_pred.astype(jnp.float32)
    p_t = yt * yp + (1.0 - yt) * (1.0 - yp)
    ce = -jnp.log(p_t)
    loss = jnp.power(1.0 - p_t, jnp.float32(gamma)) * ce
    if alpha:
        alpha_t = alpha * yt + (1.0 - alpha) * (1.0 - yt)
        loss = alpha_t * loss
    return jnp.mean(loss)


def _focal_loss_kernel(yt_ref, yp_ref, out_ref, *, gamma, alpha, k_acc,
                       row_tile, n_valid, needs_mask):
    yt = yt_ref[...].astype(jnp.float32)
    yp = yp_ref[...].astype(jnp.float32)

    # p_t = y_true*y_pred + (1 - y_true)*(1 - y_pred)
    p_t = yt * yp + (1.0 - yt) * (1.0 - yp)
    ce = -jnp.log(p_t)        # no clamp: matches the PyTorch reference exactly
    one_minus = 1.0 - p_t

    # (1 - p_t) ** gamma: unroll small integer exponents to VPU multiplies so
    # the single EUP slot only runs the log above. (For integer gamma this also
    # matches torch.pow on negative bases.)
    if float(gamma) == int(gamma) and 0 <= int(gamma) <= 4:
        g = int(gamma)
        if g == 0:
            focal = jnp.ones_like(p_t)
        else:
            focal = one_minus
            for _ in range(g - 1):
                focal = focal * one_minus
    else:
        focal = jnp.power(one_minus, jnp.float32(gamma))

    loss = focal * ce
    if alpha:  # truthiness: matches `if self.alpha:` in the PyTorch module
        alpha_t = alpha * yt + (1.0 - alpha) * (1.0 - yt)
        loss = alpha_t * loss

    if needs_mask:
        # In-kernel tail masking instead of wrapper-side padding: zero any
        # element whose global flat index is >= n. Covers both the lane
        # remainder and the (unspecified) padded region of a partial edge block.
        rows = lax.broadcasted_iota(jnp.int32, loss.shape, 0)
        lanes = lax.broadcasted_iota(jnp.int32, loss.shape, 1)
        gidx = (pl.program_id(0) * row_tile + rows) * LANES + lanes
        loss = jnp.where(gidx < n_valid, loss, 0.0)

    # Lane-dense partial sums: k_acc independent (8,128) accumulators so the
    # dependent-add chain is row_tile/(8*k_acc) long instead of row_tile/8
    # (keeps VPU latency off the critical path at big tiles). Pure VPU adds,
    # no cross-lane/cross-sublane reduce inside the kernel.
    rt = loss.shape[0]
    grp = 8 * k_acc
    partial = jnp.sum(loss.reshape(rt // grp, grp, LANES), axis=0)
    out_ref[...] = partial


def focal_loss(y_true, y_pred, gamma=2.0, alpha=None, *,
               min_kernel_elements=SMALL_N_FAST_PATH):
    assert y_true.shape == y_pred.shape
    n = y_true.size
    rows_needed = pl.cdiv(n, LANES)

    # Small-n fast path: fused XLA elementwise+reduce is strictly faster than a
    # pallas_call for tiny inputs (and the kernel needs >= 8 lane-rows).
    if n < min_kernel_elements or rows_needed < 8:
        return _focal_loss_jnp(y_true, y_pred, gamma, alpha)

    yt = jnp.reshape(y_true, (-1,))
    yp = jnp.reshape(y_pred, (-1,))

    rem = n % LANES
    if rem:
        # Rare: only pad up to the next lane multiple (< 128 extra elements);
        # the padded values are masked out in-kernel so zeros are fine.
        # TODO(synk): a fully copy-free path for n % 128 != 0 would need a
        # ragged/BoundedSlice last block; not worth it for this loss.
        pad = LANES - rem
        yt = jnp.pad(yt, (0, pad))
        yp = jnp.pad(yp, (0, pad))

    rows_total = yt.size // LANES
    yt2 = yt.reshape(rows_total, LANES)
    yp2 = yp.reshape(rows_total, LANES)

    # Dtype-aware sublane multiple so input DMAs stay full packed vregs
    # (the f32 cast happens in-kernel).
    sub = max(_sublane_multiple(yt2.dtype), _sublane_multiple(yp2.dtype))

    # Tile selection: big blocks for HBM streaming, but aim for >= 2 grid steps
    # so both v7x TensorCores participate via the "parallel" grid axis.
    row_tile = min(MAX_ROW_TILE,
                   max(sub, _round_up(pl.cdiv(rows_total, 2), sub)))
    num_blocks = pl.cdiv(rows_total, row_tile)

    needs_mask = (num_blocks * row_tile != rows_total) or (rows_total * LANES != n)

    # Number of independent (8,128) accumulators per block (power of two
    # dividing row_tile/8).
    m = row_tile // 8
    k_acc = next(k for k in (8, 4, 2, 1) if m % k == 0)

    kernel = functools.partial(
        _focal_loss_kernel, gamma=float(gamma), alpha=alpha, k_acc=k_acc,
        row_tile=row_tile, n_valid=n, needs_mask=needs_mask)

    in_spec_kwargs = {}
    if num_blocks >= 3:
        # Third input buffer hides DMA issue jitter on long streams (v7x).
        in_spec_kwargs["pipeline_mode"] = pl.Buffered(3)
    in_spec = pl.BlockSpec((row_tile, LANES), lambda i: (i, 0), **in_spec_kwargs)

    partials = pl.pallas_call(
        kernel,
        out_shape=jax.ShapeDtypeStruct((num_blocks * 8 * k_acc, LANES),
                                       jnp.float32),
        grid_spec=pltpu.PrefetchScalarGridSpec(
            num_scalar_prefetch=0,
            grid=(num_blocks,),
            in_specs=[in_spec, in_spec],
            out_specs=pl.BlockSpec((8 * k_acc, LANES), lambda i: (i, 0)),
        ),
        compiler_params=pltpu.CompilerParams(
            dimension_semantics=("parallel",),
            vmem_limit_bytes=32 << 20,  # keeps the big tiles compiling on v5e
        ),
    )(yt2, yp2)

    # Tiny final reduction + divide outside the kernel.
    return jnp.sum(partials) / jnp.float32(n)


if __name__ == "__main__":
    key = jax.random.PRNGKey(0)
    k1, k2, k3, k4 = jax.random.split(key, 4)

    gamma = 2.0
    alpha = 0.25  # deterministic "parameter" choices from __init__

    # NCHW-shaped inputs consistent with a segmentation-style use of FocalLoss.
    shape = (2, 4, 16, 16)
    y_true = jax.random.bernoulli(k1, p=0.3, shape=shape).astype(jnp.float32)
    y_pred = jax.nn.sigmoid(jax.random.normal(k2, shape, jnp.float32))

    # Force the Pallas kernel path (the default would take the small-n jnp
    # fast path for this tiny example shape).
    out = focal_loss(y_true, y_pred, gamma=gamma, alpha=alpha,
                     min_kernel_elements=0)
    out = jax.block_until_ready(out)
    ref = _focal_loss_jnp(y_true, y_pred, gamma, alpha)
    assert jnp.allclose(out, ref, rtol=1e-5, atol=1e-6), (out, ref)

    # Odd-sized input: exercises the in-kernel tail masking (partial edge block
    # plus lane remainder) through the kernel path.
    shape2 = (3, 5, 7, 11)
    y_true2 = jax.random.bernoulli(k3, p=0.4, shape=shape2).astype(jnp.float32)
    y_pred2 = jax.nn.sigmoid(jax.random.normal(k4, shape2, jnp.float32))
    out2 = focal_loss(y_true2, y_pred2, gamma=gamma, alpha=alpha,
                      min_kernel_elements=0)
    out2 = jax.block_until_ready(out2)
    ref2 = _focal_loss_jnp(y_true2, y_pred2, gamma, alpha)
    assert jnp.allclose(out2, ref2, rtol=1e-5, atol=1e-6), (out2, ref2)

    print("KERNEL_OK")
</pallas_src>

<mosaic_0001>
module attributes {stable_mosaic.version = 11 : i64} {
  func.func @_focal_loss_kernel(%arg0: i32, %arg1: memref<8x128xf32, #tpu.memory_space<vmem>>, %arg2: memref<8x128xf32, #tpu.memory_space<vmem>>, %arg3: memref<8x128xf32, #tpu.memory_space<vmem>>) attributes {dimension_semantics = [#tpu.dimension_semantics<parallel>], iteration_bounds = array<i64: 2>, scalar_prefetch = 0 : i64, scratch_operands = 0 : i64, tpu.core_type = #tpu.core_type<tc>, window_params = [{transform_indices = @transform_0, window_bounds = array<i64: 8, 128>}, {transform_indices = @transform_1, window_bounds = array<i64: 8, 128>}, {transform_indices = @transform_2, window_bounds = array<i64: 8, 128>}]} {
    %c0 = arith.constant 0 : index
    %c0_0 = arith.constant 0 : index
    %0 = vector.load %arg1[%c0, %c0_0] : memref<8x128xf32, #tpu.memory_space<vmem>>, vector<8x128xf32>
    %c0_1 = arith.constant 0 : index
    %c0_2 = arith.constant 0 : index
    %1 = vector.load %arg2[%c0_1, %c0_2] : memref<8x128xf32, #tpu.memory_space<vmem>>, vector<8x128xf32>
    %2 = arith.mulf %0, %1 : vector<8x128xf32>
    %cst = arith.constant 1.000000e+00 : f32
    %3 = vector.broadcast %cst : f32 to vector<8x128xf32>
    %4 = arith.subf %3, %0 : vector<8x128xf32>
    %cst_3 = arith.constant 1.000000e+00 : f32
    %5 = vector.broadcast %cst_3 : f32 to vector<8x128xf32>
    %6 = arith.subf %5, %1 : vector<8x128xf32>
    %7 = arith.mulf %4, %6 : vector<8x128xf32>
    %8 = arith.addf %2, %7 : vector<8x128xf32>
    %9 = math.log %8 : vector<8x128xf32>
    %cst_4 = arith.constant 0.000000e+00 : f32
    %10 = vector.broadcast %cst_4 : f32 to vector<8x128xf32>
    %11 = arith.subf %10, %9 : vector<8x128xf32>
    %cst_5 = arith.constant 1.000000e+00 : f32
    %12 = vector.broadcast %cst_5 : f32 to vector<8x128xf32>
    %13 = arith.subf %12, %8 : vector<8x128xf32>
    %14 = arith.mulf %13, %13 : vector<8x128xf32>
    %15 = arith.mulf %14, %11 : vector<8x128xf32>
    %cst_6 = arith.constant 2.500000e-01 : f32
    %16 = vector.broadcast %cst_6 : f32 to vector<8x128xf32>
    %17 = arith.mulf %16, %0 : vector<8x128xf32>
    %cst_7 = arith.constant 1.000000e+00 : f32
    %18 = vector.broadcast %cst_7 : f32 to vector<8x128xf32>
    %19 = arith.subf %18, %0 : vector<8x128xf32>
    %cst_8 = arith.constant 7.500000e-01 : f32
    %20 = vector.broadcast %cst_8 : f32 to vector<8x128xf32>
    %21 = arith.mulf %20, %19 : vector<8x128xf32>
    %22 = arith.addf %17, %21 : vector<8x128xf32>
    %23 = arith.mulf %22, %15 : vector<8x128xf32>
    %24 = vector.shape_cast %23 : vector<8x128xf32> to vector<1x8x128xf32>
    %cst_9 = arith.constant dense<0.000000e+00> : vector<8x128xf32>
    %25 = vector.multi_reduction <add>, %24, %cst_9 [0] : vector<1x8x128xf32> to vector<8x128xf32>
    %c0_10 = arith.constant 0 : index
    %c0_11 = arith.constant 0 : index
    %26 = vector.load %arg3[%c0_10, %c0_11] : memref<8x128xf32, #tpu.memory_space<vmem>>, vector<8x128xf32>
    tpu.vector_store %arg3[%c0_10, %c0_11], %25 {strides = array<i32>} : memref<8x128xf32, #tpu.memory_space<vmem>>, vector<8x128xf32>,
    return
  }
  func.func @transform_0(%arg0: i32) -> (i32, i32) {
    %c0_i32 = arith.constant 0 : i32
    %c0_i32_0 = arith.constant 0 : i32
    return %arg0, %c0_i32 : i32, i32
  }
  func.func @transform_1(%arg0: i32) -> (i32, i32) {
    %c0_i32 = arith.constant 0 : i32
    %c0_i32_0 = arith.constant 0 : i32
    return %arg0, %c0_i32 : i32, i32
  }
  func.func @transform_2(%arg0: i32) -> (i32, i32) {
    %c0_i32 = arith.constant 0 : i32
    %c0_i32_0 = arith.constant 0 : i32
    return %arg0, %c0_i32 : i32, i32
  }
}

</mosaic_0001>

<bundles_post_ra>
// kernel: tpu_custom_call.1
= control target key start
LH: loop header
LB: loop body
LE: loop exit
PB: predicated region body
PF: predicated region fallthrough
CT: control target
= control target key end

     0   :  { %7 = vsyncpa [#allocation3], 0  ;;  %s754_s0 = inlined_call_operand.hbm [shape: f32[16,128], index: 0, kind: input, shape index: {}]   ;;  %s755_s1 = inlined_call_operand.hbm [shape: f32[16,128], index: 1, kind: input, shape index: {}]   ;;  %s756_s2 = inlined_call_operand.hbm [shape: f32[16,128], index: 2, kind: output, shape index: {}]  }
   0x1   :  { %9 = vsyncpa [#allocation3 + $0x1], 0 }
   0x2   :  { %10 = vsyncpa [#allocation6], 0 }
   0x3   :  { %12 = vsyncpa [#allocation6 + $0x1], 0 }
   0x4   :  { %13 = vsyncpa [#allocation4], 0 }
   0x5   :  { %15 = vsyncpa [#allocation4 + $0x1], 0  ;;  %s540_s9 = smov 0   ;;  %s542_s10 = smov 0  }
   0x6   :  { %s544_s11 = smov 0   ;;  %s546_s12 = smov 0  }
   0x7 LB: > { %s561_s13 = sadd.s32 4294967295, %s520_s12   ;;  %s322_s14 = sadd.s32 4294967294, %s520_s12   ;;  %s520_s12 = sphi %s546_s12, %s775_s12   ;;  %s516_s11 = sphi %s544_s11, %s774_s11   ;;  %s512_s10 = sphi %s542_s10, %s773_s10   ;;  %s508_s9 = sphi %s540_s9, %s772_s9  }
   0x8   : > { %s565_s15 = sadd.s32 1, %s520_s12   ;;  %s28_s16 = sadd.s32 1, %s516_s11 }
   0x9   : > { %s25_s17 = ssub.s32 %s520_s12, %s565_s15  ;;  %p35_p0 = scmp.ne.s32.totalorder %s516_s11, %s512_s10 }
   0xa   : > { %p26_p1 = scmp.eq.s32.totalorder %s25_s17, 0  ;;  %p36_p2 = scmp.eq.s32.totalorder %s520_s12, 0 }
   0xb   : > { %p41_p3 = scmp.ne.s32.totalorder %s512_s10, %s508_s9  ;;  %p42_p4 = scmp.eq.s32.totalorder %s561_s13, 0 }
   0xc   : > { %s577_s18 = scalar_select %p26_p1, %s516_s11, %s28_s16  }
   0xd   : > { %p579_p5 = por %p36_p2, %p35_p0  ;;  %p583_p6 = por %p42_p4, %p41_p3 }
   0xe   : > { %p91_p7 = scmp.eq.s32.totalorder %s561_s13, 1  ;;  %p97_p8 = scmp.eq.s32.totalorder %s322_s14, 1 }
   0xf   : > { %s760_s20 = scalar_select %p583_p6, 1, 0 }
  0x10   : > { %p354_p10 = scmp.lt.s32.totalorder %s520_s12, 2  ;;  %p590_p11 = por %p91_p7, %p35_p0 }
  0x11   : > { %p594_p12 = por %p97_p8, %p41_p3  ;;  %s599_s23 = sand.u32 1, %s516_s11  }
  0x12   : > { %s761_s21 = scalar_select %p590_p11, 1, 0 }
  0x13   : > { %s762_s22 = scalar_select %p594_p12, 1, 0 }
  0x14   : > { %s326_s24 = sshll.u32 %s520_s12, 7  ;;  %s325_s25 = sshll.u32 %s599_s23, 3 }
  0x15   : > { %s608_s28 = scalar_lea.hbm %s754_s0, %s326_s24  ;;  %s121_s29 = scalar_lea.vmem [#allocation2], %s325_s25 }
  0x16   : > { %s128_s30 = sshll.u32 %s121_s29, 4  ;;  %p614_p13 = pnand %p354_p10, %p579_p5  ;;  %s618_s30 = int_to_ptr.vmem [resolvable:$true] %s128_s30 }
  0x17   : > { %s118_s4 = scalar_lea.sflag [#allocation3], %s599_s23  ;;  %s390_s5 = scalar_lea.hbm %s608_s28, 128 }
  0x18   : > { %p391_p2 = scmp.ne.s32.totalorder %s608_s28, %s390_s5  ;;  %p392_p3 = pneg %p614_p13 }
  0x19   : > { %s395_s8 = scalar_lea.hbm %s754_s0, 256  ;;  %p396_p5 = scmp.lt.u32.totalorder %s608_s28, %s754_s0 }
  0x1a   : > { %p393_p4 = pnand %p392_p3, %p391_p2  ;;  %p397_p8 = scmp.lt.u32.totalorder %s395_s8, %s390_s5 }
  0x1b   : > { %p399_p9 = scmp.lt.u32.totalorder %s390_s5, %s608_s28 }
  0x1c   : > { %p394_p7 = pneg %p393_p4  ;;  %p398_p10 = por %p397_p8, %p396_p5 }
  0x1e   : > { %p400_p0 = por %p399_p9, %p398_p10 }
  0x20   : > { %p401_p1 = pnand %p400_p0, %p394_p7 }
  0x22   : > { %404 = shalt.err (!%p401_p1)
}
  0x23   : > { %s405_s17 = scalar_lea.vmem %s618_s30, 128  ;;  %s522_s19 = smov [#allocation2]  }
  0x24   : > { %p406_p2 = scmp.ne.s32.totalorder %s618_s30, %s405_s17  ;;  %s410_s26 = sshll.u32 %s522_s19, 4  ;;  %s411_s26 = int_to_ptr.vmem [resolvable:$false] %s410_s26 }
  0x25   : > { %s412_s27 = scalar_lea.vmem %s411_s26, 256  ;;  %p413_p11 = scmp.lt.s32.totalorder %s618_s30, %s411_s26 }
  0x26   : > { %p408_p4 = pnand %p406_p2, %p392_p3  ;;  %p414_p5 = scmp.lt.s32.totalorder %s412_s27, %s405_s17 }
  0x28   : > { %p409_p12 = pneg %p408_p4  ;;  %p415_p8 = por %p414_p5, %p413_p11 }
  0x2a   : > { %p416_p9 = pnand %p415_p8, %p409_p12 }
  0x2c   : > { %419 = shalt.err (!%p416_p9)
}
  0x2d   : > { %346 = dma.hbm_to_vmem [thread:$0]  (!%p614_p13), %s608_s28, 128, %s618_s30, %s118_s4  }
  0x2e   : > { %p764_p0 = scmp.lt.s32.totalorder %s520_s12, 3  ;;  %p765_p1 = scmp.ge.s32.totalorder %s520_s12, 1 }
  0x2f   : > { %s661_s7 = scalar_lea.hbm %s755_s1, %s326_s24  ;;  %s139_s8 = scalar_lea.vmem [#allocation5], %s325_s25 }
  0x30   : > { %p652_p7 = pnand %p765_p1, %p764_p0  ;;  %s146_s14 = sshll.u32 %s139_s8, 4  ;;  %s147_s14 = int_to_ptr.vmem [resolvable:$true] %s146_s14 }
  0x31   : > { %s136_s28 = scalar_lea.sflag [#allocation6], %s599_s23  ;;  %s420_s30 = scalar_lea.hbm %s661_s7, 128 }
  0x32   : > { %s766_s29 = scalar_select %p652_p7, 1, 0 }
  0x33   : > { %p421_p11 = scmp.ne.s32.totalorder %s661_s7, %s420_s30  ;;  %s425_s24 = scalar_lea.hbm %s755_s1, 256 }
  0x34   : > { %p426_p2 = scmp.lt.u32.totalorder %s661_s7, %s755_s1  ;;  %p427_p4 = scmp.lt.u32.totalorder %s425_s24, %s420_s30 }
  0x35   : > { %p423_p12 = pnand %p421_p11, %p392_p3  ;;  %p429_p8 = scmp.lt.u32.totalorder %s420_s30, %s661_s7 }
  0x36   : > { %p428_p5 = por %p427_p4, %p426_p2 }
  0x37   : > { %p424_p10 = pneg %p423_p12 }
  0x38   : > { %p430_p9 = por %p429_p8, %p428_p5 }
  0x3a   : > { %p431_p0 = pnand %p430_p9, %p424_p10 }
  0x3c   : > { %434 = shalt.err (!%p431_p0)
}
  0x3d   : > { %s435_s23 = scalar_lea.vmem %s147_s14, 128  ;;  %s523_s25 = smov [#allocation5]  }
  0x3e   : > { %p436_p1 = scmp.ne.s32.totalorder %s147_s14, %s435_s23  ;;  %s440_s26 = sshll.u32 %s523_s25, 4  ;;  %s441_s26 = int_to_ptr.vmem [resolvable:$false] %s440_s26 }
  0x3f   : > { %s442_s27 = scalar_lea.vmem %s441_s26, 256  ;;  %p443_p6 = scmp.lt.s32.totalorder %s147_s14, %s441_s26 }
  0x40   : > { %p438_p11 = pnand %p436_p1, %p392_p3  ;;  %p444_p7 = scmp.lt.s32.totalorder %s442_s27, %s435_s23 }
  0x42   : > { %p439_p12 = pneg %p438_p11  ;;  %p445_p2 = por %p444_p7, %p443_p6 }
  0x44   : > { %p446_p4 = pnand %p445_p2, %p439_p12 }
  0x46   : > { %449 = shalt.err (!%p446_p4)
}
  0x47   : > { %349 = dma.hbm_to_vmem [thread:$0]  (!%p614_p13), %s661_s7, 128, %s147_s14, %s136_s28  }
  0x48   : > { %p767_p10 = scmp.ne.s32.totalorder %s766_s29, 0 }
  0x49   : > { %s688_s5 = sand.u32 (!%p767_p10), 1, %s512_s10   ;;  %p768_p6 = scmp.ne.s32.totalorder (!%p767_p10), %s760_s20, 0 }
  0x4a   : > { %155 = sbr.rel (%p767_p10) target bundleno = 124 (0x7c), region = 28  ;;  %s691_s6 = sshll.u32 (!%p767_p10), %s688_s5, 3 }
  0x4b   : > { %s158_s8 = scalar_lea.sflag (!%p767_p10), [#allocation3], %s688_s5  ;;  %s161_s30 = scalar_lea.vmem (!%p767_p10), [#allocation2], %s691_s6 }
  0x51   : > { %495 = dma.done.wait (%p768_p6), %s158_s8, 128  }
  0x52   : > { %497 = vsyncadd (%p768_p6), %s158_s8, 4294967168  ;;  %s167_s3 = scalar_lea.sflag [#allocation6], %s688_s5  ;;  %s170_s29 = scalar_lea.vmem [#allocation5], %s691_s6 }
  0x53   : > { %499 = dma.done.wait (%p768_p6), %s167_s3, 128  }
  0x54   : > { %501 = vsyncadd (%p768_p6), %s167_s3, 4294967168  ;;  %v196_v0 = vld [vmem:[%s161_s30] sm:$0xff]  ;;  %v197_v1 = vld [vmem:[%s170_s29] sm:$0xff]  ;;  %s195_s20 = scalar_lea.vmem [#allocation7], %s691_s6  ;;  %s334_s14 = sshll.u32 %s561_s13, 7 }
  0x55   : > { %v198_v2 = vmul.f32 %v197_v1, %v196_v0  ;;  %v199_v3 = vsub.f32 1.0, %v196_v0  ;;  %v200_v4 = vsub.f32 1.0, %v197_v1  ;;  %v209_v8 = vmul.f32 0.25, %v196_v0  ;;  %s229_s7 = sshll.u32 %s195_s20, 4  ;;  %s712_s16 = scalar_lea.hbm %s756_s2, %s334_s14  ;;  %s707_s7 = int_to_ptr.vmem [resolvable:$true] %s229_s7 }
  0x56   : > { %s216_s24 = scalar_lea.sflag [#allocation4], %s688_s5  ;;  %s450_s17 = scalar_lea.vmem %s707_s7, 128 }
  0x57   : > { %v201_v5 = vmul.f32 %v200_v4, %v199_v3  ;;  %v210_v9 = vmul.f32 0.75, %v199_v3  ;;  %p451_p13 = scmp.ne.s32.totalorder %s707_s7, %s450_s17  ;;  %p769_p3 = scmp.ne.s32.totalorder %s761_s21, 0 }
  0x58   : > { %s524_s13 = smov [#allocation7]  }
  0x59   : > { %v202_v6 = vadd.f32 %v201_v5, %v198_v2  ;;  %v211_v14 = vadd.f32 %v210_v9, %v209_v8  ;;  %p452_p7 = pnand %p451_p13, %p769_p3  ;;  %s454_s19 = sshll.u32 %s524_s13, 4  ;;  %s455_s19 = int_to_ptr.vmem [resolvable:$false] %s454_s19 }
  0x5a   : > { %s456_s23 = scalar_lea.vmem %s455_s19, 256  ;;  %p457_p8 = scmp.lt.s32.totalorder %s707_s7, %s455_s19 }
  0x5b   : > { %388 = vlog2.f32 %v202_v6  ;;  %v206_v7 = vsub.f32 1.0, %v202_v6  ;;  %p453_p5 = pneg %p452_p7  ;;  %p458_p9 = scmp.lt.s32.totalorder %s456_s23, %s450_s17 }
  0x5d   : > { %v207_v12 = vmul.f32 %v206_v7, %v206_v7  ;;  %p459_p0 = por %p458_p9, %p457_p8 }
  0x5f   : > { %p460_p1 = pnand %p459_p0, %p453_p5 }
  0x65   : > { %v389_v10 = vpop.eup %388 }
  0x66   : > { %v204_v11 = vmul.f32 0.6931472, %v389_v10 }
  0x68   : > { %v205_v13 = vsub.f32 0.0, %v204_v11 }
  0x6a   : > { %v208_v15 = vmul.f32 %v207_v12, %v205_v13 }
  0x6c   : > { %v212_v16 = vmul.f32 %v211_v14, %v208_v15 }
  0x6e   : > { %214 = vst [vmem:[%s195_s20] sm:$0xff] %v212_v16 }
  0x6f   : > { %463 = shalt.err (!%p460_p1)
}
  0x70   : > { %s464_s25 = scalar_lea.hbm %s712_s16, 128  ;;  %s468_s5 = scalar_lea.hbm %s756_s2, 256 }
  0x71   : > { %p465_p11 = scmp.ne.s32.totalorder %s712_s16, %s464_s25  ;;  %p469_p4 = scmp.lt.u32.totalorder %s712_s16, %s756_s2 }
  0x72   : > { %p470_p10 = scmp.lt.u32.totalorder %s468_s5, %s464_s25  ;;  %p472_p13 = scmp.lt.u32.totalorder %s464_s25, %s712_s16 }
  0x73   : > { %p466_p12 = pnand %p465_p11, %p769_p3 }
  0x74   : > { %p471_p6 = por %p470_p10, %p469_p4 }
  0x75   : > { %p467_p2 = pneg %p466_p12 }
  0x76   : > { %p473_p7 = por %p472_p13, %p471_p6 }
  0x78   : > { %p474_p5 = pnand %p473_p7, %p467_p2 }
  0x7a   : > { %477 = shalt.err (!%p474_p5)
}
  0x7b   : > { %341 = dma.vmem_to_hbm [thread:$0]  (%p769_p3), %s707_s7, 128, %s712_s16, %s216_s24  }
  0x7c PF: > { %s241_s30 = sand.u32 1, %s508_s9   ;;  %p770_p8 = scmp.ne.s32.totalorder %s762_s22, 0 }
  0x7d   : > { %p771_p9 = scmp.ge.s32.totalorder %s520_s12, 2  ;;  %s242_s3 = scalar_lea.sflag [#allocation4], %s241_s30 }
  0x7f   : > { %p351_p0 = pnand %p771_p9, %p770_p8 }
  0x81   : > { %503 = dma.done.wait (!%p351_p0), %s242_s3, 128  }
  0x82   : > { %505 = vsyncadd (!%p351_p0), %s242_s3, 4294967168  ;;  %p18_p1 = scmp.ge.s32.totalorder %s565_s15, 4   ;;  %s772_s9 = smov %s512_s10 }
  0x83   : > { %s773_s10 = smov %s516_s11  ;;  %s774_s11 = smov %s577_s18 }
  0x84   : > { %s775_s12 = smov %s565_s15  ;;  %20 = sbr.rel (!%p18_p1) target bundleno = 7 (0x7), region = 86 }
  0x8b   :  { %247 = vsyncpa [#allocation3], 1 }
  0x8c   :  { %249 = vsyncpa [#allocation3 + $0x1], 1 }
  0x8d   :  { %250 = vsyncpa [#allocation6], 1 }
  0x8e   :  { %252 = vsyncpa [#allocation6 + $0x1], 1 }
  0x8f   :  { %253 = vsyncpa [#allocation4], 1 }
  0x90   :  { %255 = vsyncpa [#allocation4 + $0x1], 1 }

</bundles_post_ra>
